<compile_context>
chip_gen: v5e
topology: v5e:2x2
jax: 0.10.0
libtpu: 0.0.40
codegen_flags: <defaults>
</compile_context>

<pallas_src>
import functools

import jax
import jax.numpy as jnp
import numpy as np
from jax.experimental import pallas as pl
from jax.experimental.pallas import tpu as pltpu

DEFAULT_BF = 96.0
DEFAULT_DIST_LIST = [0.5, 1, 1.5, 2, 5, 10, 20, 30, 50, 100]

_LANE = 128            # vreg lane width
_SUBLANE = 8           # f32 sublane tile
_MAX_TILE_ROWS = 2048  # 2048 x 128 x 4B = 1 MiB per f32 input per buffer


def _round_up(x, m):
    return ((x + m - 1) // m) * m


# ----------------------------- kernels ---------------------------------------
def _nomask_kernel(preds_ref, target_ref, bad_ref, *, cmin, cmax, sthresh):
    # In-kernel upcast (inputs may arrive bf16/f16; cast is free VPU work).
    p = preds_ref[...].astype(jnp.float32)
    t = jnp.clip(target_ref[...].astype(jnp.float32), cmin, cmax)
    # |p/bf - t/bf| > thresh  <=>  |p - t| > thresh*bf  (bf folded at trace time)
    bad = (jnp.abs(p - t) > sthresh).astype(jnp.float32)
    r = bad.shape[0] // _SUBLANE
    # Layout-preserving group reduce -> (8, 128) partial counts (pure VPU adds).
    bad_ref[...] = jnp.sum(bad.reshape(r, _SUBLANE, _LANE), axis=0)[None]


def _mask_kernel(preds_ref, target_ref, mask_ref, bad_ref, nval_ref, *,
                 cmin, cmax, sthresh):
    p = preds_ref[...].astype(jnp.float32)
    t = jnp.clip(target_ref[...].astype(jnp.float32), cmin, cmax)
    m = mask_ref[...] != 0                      # int8 mask, truthiness test
    bad = jnp.logical_and(jnp.abs(p - t) > sthresh, m).astype(jnp.float32)
    mv = m.astype(jnp.float32)
    r = bad.shape[0] // _SUBLANE
    bad_ref[...] = jnp.sum(bad.reshape(r, _SUBLANE, _LANE), axis=0)[None]
    nval_ref[...] = jnp.sum(mv.reshape(r, _SUBLANE, _LANE), axis=0)[None]


# ----------------------------- wrapper ----------------------------------------
def bad_pixel_ratio_metric(preds, target, valid_mask=None, *,
                           bf=DEFAULT_BF,
                           dist_list=DEFAULT_DIST_LIST,
                           delta_thresh=0.1,
                           max_tile_rows=_MAX_TILE_ROWS):
    """Pallas implementation of BadPixelRatioMetric.forward."""
    # Deterministic "parameter" setup (clamp_min / clamp_max buffers).
    inv_dist = np.asarray(bf, np.float32) / np.asarray(dist_list, np.float32)
    cmin = float(inv_dist.min())
    cmax = float(inv_dist.max())
    sthresh = float(delta_thresh) * float(bf)   # fold bf out of the kernel

    shape = preds.shape
    H, W = int(shape[-2]), int(shape[-1])
    total = int(np.prod(shape))

    # Lane-dense flat layout: [rows, 128]; rows padded to a tile-row multiple.
    n_rows = -(-total // _LANE)
    # 32-row multiple keeps both f32 (8,128) and int8 (32,128) tilings happy.
    tile_rows = _round_up(max(1, min(n_rows, int(max_tile_rows))), 32)
    padded_rows = _round_up(n_rows, tile_rows)
    grid = padded_rows // tile_rows
    pad = padded_rows * _LANE - total

    # Pad preds/target with an in-range value -> clipped delta == 0 -> never bad.
    pad_val = 0.5 * (cmin + cmax)
    p2 = jnp.pad(preds.reshape(-1), (0, pad),
                 constant_values=pad_val).reshape(padded_rows, _LANE)
    t2 = jnp.pad(target.reshape(-1), (0, pad),
                 constant_values=pad_val).reshape(padded_rows, _LANE)

    in_spec = pl.BlockSpec((tile_rows, _LANE), lambda i: (i, 0))
    out_spec = pl.BlockSpec((1, _SUBLANE, _LANE), lambda i: (i, 0, 0))
    out_sds = jax.ShapeDtypeStruct((grid, _SUBLANE, _LANE), jnp.float32)
    cparams = pltpu.CompilerParams(
        dimension_semantics=("parallel",),        # no carried state -> megacore OK
        vmem_limit_bytes=32 * 1024 * 1024,        # ~5 MiB actual footprint
    )

    if valid_mask is None:
        kernel = functools.partial(_nomask_kernel, cmin=cmin, cmax=cmax,
                                   sthresh=sthresh)
        bad_part = pl.pallas_call(
            kernel,
            out_shape=out_sds,
            grid=(grid,),
            in_specs=[in_spec, in_spec],
            out_specs=out_spec,
            compiler_params=cparams,
        )(p2, t2)
        # Exact integer accumulation of the partial counts.
        bad_total = jnp.sum(bad_part.astype(jnp.int32))
        # NOTE: the torch module divides by H*W only (not B*C*H*W) when no mask
        # is given -- replicated faithfully here.
        return bad_total.astype(jnp.float32) / jnp.float32(H * W)

    m2 = jnp.pad(valid_mask.reshape(-1).astype(jnp.int8), (0, pad),
                 constant_values=0).reshape(padded_rows, _LANE)
    kernel = functools.partial(_mask_kernel, cmin=cmin, cmax=cmax,
                               sthresh=sthresh)
    bad_part, nval_part = pl.pallas_call(
        kernel,
        out_shape=(out_sds, out_sds),
        grid=(grid,),
        in_specs=[in_spec, in_spec, in_spec],
        out_specs=(out_spec, out_spec),
        compiler_params=cparams,
    )(p2, t2, m2)
    bad_total = jnp.sum(bad_part.astype(jnp.int32))
    n_valid = jnp.sum(nval_part.astype(jnp.int32))
    # torch: "... if n_elems > 0 else 1.0"
    return jnp.where(
        n_valid > 0,
        bad_total.astype(jnp.float32) / jnp.maximum(n_valid, 1).astype(jnp.float32),
        jnp.float32(1.0))


# ----------------------------- reference --------------------------------------
def _ref_metric(preds, target, valid_mask=None, *, bf=DEFAULT_BF,
                dist_list=DEFAULT_DIST_LIST, delta_thresh=0.1):
    inv_dist = np.asarray(bf, np.float32) / np.asarray(dist_list, np.float32)
    t = jnp.clip(target, float(inv_dist.min()), float(inv_dist.max())) / bf
    p = preds / bf
    delta = jnp.abs(p - t)
    if valid_mask is not None:
        bad = jnp.sum(jnp.logical_and(delta > delta_thresh, valid_mask)
                      .astype(jnp.float32))
        n = jnp.sum(valid_mask.astype(jnp.float32))
        return jnp.where(n > 0, bad / jnp.maximum(n, 1.0), jnp.float32(1.0))
    H, W = delta.shape[-2:]
    return jnp.sum((delta > delta_thresh).astype(jnp.float32)) / (H * W)


# ----------------------------- main --------------------------------------------
if __name__ == "__main__":
    key = jax.random.PRNGKey(0)
    k1, k2, k3 = jax.random.split(key, 3)

    B, C, H, W = 2, 4, 16, 16  # NCHW inverse-depth maps
    target = jax.random.uniform(k1, (B, C, H, W), jnp.float32,
                                minval=0.3, maxval=220.0)
    preds = target + jax.random.normal(k2, (B, C, H, W), jnp.float32) * 15.0
    valid_mask = jax.random.uniform(k3, (B, C, H, W), jnp.float32) > 0.3

    # No-mask path.
    out = jax.block_until_ready(bad_pixel_ratio_metric(preds, target))
    ref = _ref_metric(preds, target)
    assert np.allclose(np.asarray(out), np.asarray(ref), atol=1e-6), (out, ref)

    # Masked path.
    out_m = jax.block_until_ready(
        bad_pixel_ratio_metric(preds, target, valid_mask))
    ref_m = _ref_metric(preds, target, valid_mask)
    assert np.allclose(np.asarray(out_m), np.asarray(ref_m), atol=1e-6), (
        out_m, ref_m)

    # Multi-tile / "parallel" grid path (force several tiles via max_tile_rows).
    B2, C2, H2, W2 = 2, 4, 32, 32
    target2 = jax.random.uniform(k2, (B2, C2, H2, W2), jnp.float32,
                                 minval=0.3, maxval=220.0)
    preds2 = target2 + jax.random.normal(k3, (B2, C2, H2, W2),
                                         jnp.float32) * 15.0
    mask2 = jax.random.uniform(k1, (B2, C2, H2, W2), jnp.float32) > 0.3
    out2 = jax.block_until_ready(
        bad_pixel_ratio_metric(preds2, target2, mask2, max_tile_rows=32))
    ref2 = _ref_metric(preds2, target2, mask2)
    assert np.allclose(np.asarray(out2), np.asarray(ref2), atol=1e-6), (
        out2, ref2)
    out2n = jax.block_until_ready(
        bad_pixel_ratio_metric(preds2, target2, max_tile_rows=32))
    ref2n = _ref_metric(preds2, target2)
    assert np.allclose(np.asarray(out2n), np.asarray(ref2n), atol=1e-6), (
        out2n, ref2n)

    print("KERNEL_OK")
</pallas_src>

<mosaic_0001>
module attributes {stable_mosaic.version = 11 : i64} {
  func.func @_nomask_kernel(%arg0: i32, %arg1: memref<32x128xf32, #tpu.memory_space<vmem>>, %arg2: memref<32x128xf32, #tpu.memory_space<vmem>>, %arg3: memref<1x8x128xf32, #tpu.memory_space<vmem>>) attributes {dimension_semantics = [#tpu.dimension_semantics<parallel>], iteration_bounds = array<i64: 1>, scalar_prefetch = 0 : i64, scratch_operands = 0 : i64, tpu.core_type = #tpu.core_type<tc>, window_params = [{transform_indices = @transform_0, window_bounds = array<i64: 32, 128>}, {transform_indices = @transform_1, window_bounds = array<i64: 32, 128>}, {transform_indices = @transform_2, window_bounds = array<i64: 1, 8, 128>}]} {
    %c0 = arith.constant 0 : index
    %c0_0 = arith.constant 0 : index
    %0 = vector.load %arg1[%c0, %c0_0] : memref<32x128xf32, #tpu.memory_space<vmem>>, vector<32x128xf32>
    %c0_1 = arith.constant 0 : index
    %c0_2 = arith.constant 0 : index
    %1 = vector.load %arg2[%c0_1, %c0_2] : memref<32x128xf32, #tpu.memory_space<vmem>>, vector<32x128xf32>
    %cst = arith.constant 0.959999978 : f32
    %cst_3 = arith.constant 1.920000e+02 : f32
    %2 = vector.broadcast %cst : f32 to vector<32x128xf32>
    %3 = arith.maximumf %2, %1 : vector<32x128xf32>
    %4 = vector.broadcast %cst_3 : f32 to vector<32x128xf32>
    %5 = arith.minimumf %4, %3 : vector<32x128xf32>
    %6 = arith.subf %0, %5 : vector<32x128xf32>
    %7 = math.absf %6 : vector<32x128xf32>
    %cst_4 = arith.constant 9.600000e+00 : f32
    %8 = vector.broadcast %cst_4 : f32 to vector<32x128xf32>
    %9 = arith.cmpf ogt, %7, %8 : vector<32x128xf32>
    %10 = arith.extui %9 : vector<32x128xi1> to vector<32x128xi32>
    %11 = arith.sitofp %10 : vector<32x128xi32> to vector<32x128xf32>
    %12 = vector.shape_cast %11 : vector<32x128xf32> to vector<4x8x128xf32>
    %cst_5 = arith.constant dense<0.000000e+00> : vector<8x128xf32>
    %13 = vector.multi_reduction <add>, %12, %cst_5 [0] : vector<4x8x128xf32> to vector<8x128xf32>
    %14 = vector.shape_cast %13 : vector<8x128xf32> to vector<1x8x128xf32>
    %c0_6 = arith.constant 0 : index
    %c0_7 = arith.constant 0 : index
    %c0_8 = arith.constant 0 : index
    %15 = vector.load %arg3[%c0_6, %c0_7, %c0_8] : memref<1x8x128xf32, #tpu.memory_space<vmem>>, vector<1x8x128xf32>
    tpu.vector_store %arg3[%c0_6, %c0_7, %c0_8], %14 {strides = array<i32>} : memref<1x8x128xf32, #tpu.memory_space<vmem>>, vector<1x8x128xf32>,
    return
  }
  func.func @transform_0(%arg0: i32) -> (i32, i32) {
    %c0_i32 = arith.constant 0 : i32
    %c0_i32_0 = arith.constant 0 : i32
    return %arg0, %c0_i32 : i32, i32
  }
  func.func @transform_1(%arg0: i32) -> (i32, i32) {
    %c0_i32 = arith.constant 0 : i32
    %c0_i32_0 = arith.constant 0 : i32
    return %arg0, %c0_i32 : i32, i32
  }
  func.func @transform_2(%arg0: i32) -> (i32, i32, i32) {
    %c0_i32 = arith.constant 0 : i32
    %c0_i32_0 = arith.constant 0 : i32
    %c0_i32_1 = arith.constant 0 : i32
    return %arg0, %c0_i32, %c0_i32_0 : i32, i32, i32
  }
}

</mosaic_0001>

<bundles_post_ra>
// kernel: tpu_custom_call.1
= control target key start
LH: loop header
LB: loop body
LE: loop exit
PB: predicated region body
PF: predicated region fallthrough
CT: control target
= control target key end

     0   :  { %7 = vsyncpa [#allocation3], 0  ;;  %s220_s0 = inlined_call_operand.hbm [shape: f32[32,128], index: 0, kind: input, shape index: {}]   ;;  %s221_s1 = inlined_call_operand.hbm [shape: f32[32,128], index: 1, kind: input, shape index: {}]   ;;  %s222_s2 = inlined_call_operand.hbm [shape: f32[1,8,128], index: 2, kind: output, shape index: {}]  }
   0x1   :  { %8 = vsyncpa [#allocation6], 0 }
   0x2   :  { %9 = vsyncpa [#allocation4], 0  ;;  %s14_s11 = sshll.u32 %s220_s0, 4  ;;  %s190_s12 = smov [#allocation2]   ;;  %s15_s11 = int_to_ptr.hbm [resolvable:$true] %s14_s11 }
   0x3   :  { %s16_s13 = sshll.u32 %s190_s12, 4  ;;  %s27_s16 = sshll.u32 %s221_s1, 4  ;;  %s17_s13 = int_to_ptr.vmem [resolvable:$true] %s16_s13  ;;  %s28_s16 = int_to_ptr.hbm [resolvable:$true] %s27_s16 }
   0x4   :  { %s191_s17 = smov 128   ;;  %s192_s18 = smov 8  }
   0x5   :  { %22 = dma.hbm_to_vmem [thread:$0]  %s15_s11, 512, %s17_s13, [#allocation3], %s191_s17, %s191_s17, %s192_s18  }
   0x6   :  { %s193_s19 = smov [#allocation5]  }
   0x7   :  { %s29_s20 = sshll.u32 %s193_s19, 4  ;;  %s30_s20 = int_to_ptr.vmem [resolvable:$true] %s29_s20 }
   0x8   :  { %35 = dma.hbm_to_vmem [thread:$0]  %s28_s16, 512, %s30_s20, [#allocation6], %s191_s17, %s191_s17, %s192_s18  }
   0x9   :  { %184 = dma.done.wait [#allocation3], 512  }
   0xa   :  { %185 = vsyncadd [#allocation3], 4294966784 }
   0xb   :  { %186 = dma.done.wait [#allocation6], 512  }
   0xc   :  { %187 = vsyncadd [#allocation6], 4294966784  ;;  %v48_v0 = vld [vmem:[#allocation5] sm:$0xff]  ;;  %v49_v1 = vld [vmem:[#allocation5 + $0x8] sm:$0xff]  ;;  %v194_v24 = vmov 0.0   ;;  %s195_s0 = smov [#allocation7]  }
   0xd   :  { %v50_v2 = vld [vmem:[#allocation5 + $0x10] sm:$0xff]  ;;  %v51_v3 = vld [vmem:[#allocation5 + $0x18] sm:$0xff]  ;;  %v52_v4 = vmax.f32 %v48_v0, 0.96  ;;  %v53_v5 = vmax.f32 %v49_v1, 0.96 }
   0xe   :  { %v44_v6 = vld [vmem:[#allocation2] sm:$0xff]  ;;  %v45_v7 = vld [vmem:[#allocation2 + $0x8] sm:$0xff]  ;;  %v54_v8 = vmax.f32 %v50_v2, 0.96  ;;  %v55_v9 = vmax.f32 %v51_v3, 0.96 }
   0xf   :  { %v46_v10 = vld [vmem:[#allocation2 + $0x10] sm:$0xff]  ;;  %v47_v11 = vld [vmem:[#allocation2 + $0x18] sm:$0xff]  ;;  %v56_v12 = vmin.f32 %v52_v4, 192.0  ;;  %v57_v13 = vmin.f32 %v53_v5, 192.0  ;;  %s89_s1 = sshll.u32 %s195_s0, 4  ;;  %s91_s23 = sshll.u32 %s222_s2, 4  ;;  %s90_s1 = int_to_ptr.vmem [resolvable:$true] %s89_s1  ;;  %s92_s23 = int_to_ptr.hbm [resolvable:$true] %s91_s23 }
  0x10   :  { %v58_v14 = vmin.f32 %v54_v8, 192.0  ;;  %v59_v15 = vmin.f32 %v55_v9, 192.0 }
  0x11   :  { %v60_v16 = vsub.f32 %v44_v6, %v56_v12  ;;  %v61_v17 = vsub.f32 %v45_v7, %v57_v13 }
  0x12   :  { %v62_v18 = vsub.f32 %v46_v10, %v58_v14  ;;  %v63_v19 = vsub.f32 %v47_v11, %v59_v15 }
  0x13   :  { %v64_v20 = vand.u32 2147483647, %v60_v16  ;;  %v65_v21 = vand.u32 2147483647, %v61_v17 }
  0x14   :  { %v66_v22 = vand.u32 2147483647, %v62_v18  ;;  %v67_v23 = vand.u32 2147483647, %v63_v19 }
  0x15   :  { %vm68_vm0 = vcmp.gt.f32.partialorder %v64_v20, 9.6  ;;  %vm69_vm1 = vcmp.gt.f32.partialorder %v65_v21, 9.6 }
  0x16   :  { %vm70_vm2 = vcmp.gt.f32.partialorder %v66_v22, 9.6  ;;  %vm71_vm3 = vcmp.gt.f32.partialorder %v67_v23, 9.6  ;;  %v102_v25 = vsel %vm68_vm0, 1.0, %v194_v24  ;;  %v103_v26 = vsel %vm69_vm1, 1.0, %v194_v24 }
  0x17   :  { %v104_v27 = vsel %vm70_vm2, 1.0, %v194_v24  ;;  %v80_v28 = vadd.f32 %v103_v26, %v102_v25  ;;  %v105_v29 = vsel %vm71_vm3, 1.0, %v194_v24 }
  0x19   :  { %v81_v30 = vadd.f32 %v104_v27, %v80_v28 }
  0x1b   :  { %v82_v31 = vadd.f32 %v105_v29, %v81_v30 }
  0x1d   :  { %83 = vst [vmem:[#allocation7] sm:$0xff] %v82_v31 }
  0x1e   :  { %94 = dma.vmem_to_hbm [thread:$0]  %s90_s1, 128, %s92_s23, [#allocation4]  }
  0x1f   :  { %188 = dma.done.wait [#allocation4], 128  }
  0x20   :  { %189 = vsyncadd [#allocation4], 4294967168 }
  0x21   :  { %99 = vsyncpa [#allocation3], 1 }
  0x22   :  { %100 = vsyncpa [#allocation6], 1 }
  0x23   :  { %101 = vsyncpa [#allocation4], 1 }

</bundles_post_ra>
